<compile_context>
chip_gen: v5e
topology: v5e:2x2
jax: 0.10.0
libtpu: 0.0.40
codegen_flags: <defaults>
</compile_context>

<pallas_src>
import functools

import jax
import jax.numpy as jnp
from jax import lax
from jax.experimental import pallas as pl
from jax.experimental.pallas import tpu as pltpu


def _gelu(x):
    # tanh-approximate GELU built from ops that lower cleanly in Mosaic (EUP tanh).
    c = 0.7978845608028654  # sqrt(2/pi)
    return 0.5 * x * (1.0 + jnp.tanh(c * (x + 0.044715 * x * x * x)))


def _layernorm(x, gamma, beta, eps):
    mean = jnp.mean(x, axis=-1, keepdims=True)
    var = jnp.mean(jnp.square(x - mean), axis=-1, keepdims=True)
    return (x - mean) * lax.rsqrt(var + eps) * gamma + beta


def encoder_head_kernel(x_ref, wfc_ref, bfc_ref, w1_ref, b1_ref, w2_ref, b2_ref,
                        g_ref, bt_ref, o_ref, *, eps, ffn_chunk):
    # x_ref : VMEM (TS, E) bf16   token tile of ESM encoder features
    # wfc   : (E, H) bf16   bfc : (1, H) f32      -- self.fc
    # w1    : (H, F) bf16   b1  : (1, F) f32      -- ffn.fc1   (F = rff * H)
    # w2    : (F, H) bf16   b2  : (1, H) f32      -- ffn.fc2
    # g, bt : (1, H) f32                          -- self.norm (shared by both LNs)
    # o_ref : VMEM (TS, H)
    gamma = g_ref[...].astype(jnp.float32)
    beta = bt_ref[...].astype(jnp.float32)

    # fc -> GELU -> dropout(eval = identity): bf16 x bf16 -> f32 acc (native MXU path)
    h = jnp.dot(x_ref[...], wfc_ref[...], preferred_element_type=jnp.float32)
    h = _gelu(h + bfc_ref[...].astype(jnp.float32))                    # (TS, H) f32

    # first LayerNorm (f32 statistics)
    h = _layernorm(h, gamma, beta, eps)
    h_b = h.astype(jnp.bfloat16)                                       # matmul operand

    # FFN: Linear -> GELU -> (dropout) -> Linear -> (dropout),
    # chunked over F so the (TS, F) f32 activation never materializes whole.
    F = w1_ref.shape[1]
    n_chunks = F // ffn_chunk                                          # static
    acc = jnp.zeros(o_ref.shape, jnp.float32)                          # (TS, H)
    for c in range(n_chunks):                                          # fully unrolled
        lo, hi = c * ffn_chunk, (c + 1) * ffn_chunk
        f = jnp.dot(h_b, w1_ref[:, lo:hi], preferred_element_type=jnp.float32)
        f = _gelu(f + b1_ref[:, lo:hi].astype(jnp.float32))            # (TS, chunk)
        acc = acc + jnp.dot(f.astype(jnp.bfloat16), w2_ref[lo:hi, :],
                            preferred_element_type=jnp.float32)

    # second LayerNorm (same affine params: the module reuses self.norm)
    y = _layernorm(acc + b2_ref[...].astype(jnp.float32), gamma, beta, eps)
    o_ref[...] = y.astype(o_ref.dtype)


def _plan_tiles(n_tokens, block_tokens):
    """Pick a token-tile size (multiple of 8).

    Preference order: (1) no padding (avoids an extra HBM copy of the input),
    (2) at least two grid steps (so v7x's two TensorCores both get work),
    (3) the largest tile.  Returns (tile_size, padded_token_count)."""
    cap = min(block_tokens, max(8, ((n_tokens + 7) // 8) * 8))
    best_key, best = None, None
    for ts in range((cap // 8) * 8, 7, -8):
        pad = (-n_tokens) % ts
        steps = (n_tokens + pad) // ts
        key = (pad == 0, steps >= 2, ts)
        if best_key is None or key > best_key:
            best_key, best = key, (ts, n_tokens + pad)
    return best


def _ffn_chunk(F, target=512):
    """Largest lane-aligned chunk <= target that divides F (else F itself)."""
    if F <= target:
        return F
    for c in range(target, 127, -128):
        if F % c == 0:
            return c
    return F


def encoder_head_forward(feat, w_fc, b_fc, w1, b1, w2, b2, gamma, beta,
                         *, eps=1e-5, block_tokens=512):
    """Pallas implementation of Encoder.forward downstream of the ESM encoder."""
    B, S, E = feat.shape
    H = w_fc.shape[1]
    F = w1.shape[1]
    N = B * S

    # -------- one-time XLA-level prep (outside the grid loop) --------
    x = feat.reshape(N, E).astype(jnp.bfloat16)        # bf16 token stream (halves HBM read)
    wfc_b = w_fc.astype(jnp.bfloat16)
    w1_b = w1.astype(jnp.bfloat16)
    w2_b = w2.astype(jnp.bfloat16)
    bfc = b_fc.reshape(1, H).astype(jnp.float32)
    b1r = b1.reshape(1, F).astype(jnp.float32)
    b2r = b2.reshape(1, H).astype(jnp.float32)
    g = gamma.reshape(1, H).astype(jnp.float32)
    bt = beta.reshape(1, H).astype(jnp.float32)

    ts, n_pad = _plan_tiles(N, block_tokens)
    if n_pad != N:
        x = jnp.pad(x, ((0, n_pad - N), (0, 0)))        # zero rows are finite & discarded
    grid = (n_pad // ts,)

    ffn_chunk = _ffn_chunk(F)

    # Resident params: constant index_map + single buffer (no wasted double-buffer VMEM).
    def resident(shape):
        return pl.BlockSpec(shape, lambda i: (0, 0), pipeline_mode=pl.Buffered(1))

    out_bytes = jnp.dtype(feat.dtype).itemsize
    weight_vmem = 2 * (E * H + H * F + F * H) + 4 * (3 * H + F + H)     # bf16 weights + f32 bias/LN
    io_vmem = 2 * ts * E * 2 + 2 * ts * H * out_bytes                   # double-buffered x / out
    work_vmem = ts * 4 * (3 * H + 2 * ffn_chunk)                        # live f32 intermediates
    vmem_limit = int(min(max(2 * (weight_vmem + io_vmem + work_vmem),
                             32 * 1024 * 1024), 64 * 1024 * 1024))

    cost = pl.CostEstimate(
        flops=2 * n_pad * (E * H + 2 * H * F),
        transcendentals=n_pad * (H + F),
        bytes_accessed=n_pad * E * 2 + n_pad * H * out_bytes
                       + 2 * (E * H + H * F + F * H) + 4 * (3 * H + F + H))

    out = pl.pallas_call(
        functools.partial(encoder_head_kernel, eps=eps, ffn_chunk=ffn_chunk),
        out_shape=jax.ShapeDtypeStruct((n_pad, H), feat.dtype),
        grid=grid,
        in_specs=[
            pl.BlockSpec((ts, E), lambda i: (i, 0)),    # streamed token tile (double-buffered)
            resident((E, H)),                           # fc weight
            resident((1, H)),                           # fc bias
            resident((H, F)),                           # ffn.fc1 weight
            resident((1, F)),                           # ffn.fc1 bias
            resident((F, H)),                           # ffn.fc2 weight
            resident((1, H)),                           # ffn.fc2 bias
            resident((1, H)),                           # LayerNorm gamma
            resident((1, H)),                           # LayerNorm beta
        ],
        out_specs=pl.BlockSpec((ts, H), lambda i: (i, 0)),
        compiler_params=pltpu.CompilerParams(
            dimension_semantics=("parallel",),          # v7x: split token tiles over 2 TCs
            vmem_limit_bytes=vmem_limit),
        cost_estimate=cost,
    )(x, wfc_b, bfc, w1_b, b1r, w2_b, b2r, g, bt)

    return out[:N].reshape(B, S, H)


def encoder_head_reference(feat, w_fc, b_fc, w1, b1, w2, b2, gamma, beta, eps=1e-5):
    def ln(v):
        mean = jnp.mean(v, axis=-1, keepdims=True)
        var = jnp.mean((v - mean) ** 2, axis=-1, keepdims=True)
        return (v - mean) / jnp.sqrt(var + eps) * gamma + beta

    h = _gelu(feat @ w_fc + b_fc)
    h = ln(h)
    f = _gelu(h @ w1 + b1)
    f = f @ w2 + b2
    return ln(f)


if __name__ == "__main__":
    # Small, TPU-friendly config consistent with the module:
    B, S = 2, 8          # batch, sequence length (post [1:-1] trim)
    E = 256              # encode_dim (stand-in for the ESM-IF1 feature dim)
    H = 128              # hidden_dim (multiple of 128 -> lane-dense)
    RFF = 4              # ffn expansion
    F = RFF * H

    key = jax.random.PRNGKey(0)
    k_feat, k_fc, k_w1, k_w2 = jax.random.split(key, 4)

    # `feat` stands in for the (untranslatable) pretrained ESM encoder output.
    feat = jax.random.normal(k_feat, (B, S, E), dtype=jnp.float32)

    w_fc = 0.02 * jax.random.normal(k_fc, (E, H), dtype=jnp.float32)
    b_fc = jnp.zeros((H,), dtype=jnp.float32)
    w1 = 0.02 * jax.random.normal(k_w1, (H, F), dtype=jnp.float32)
    b1 = jnp.zeros((F,), dtype=jnp.float32)
    w2 = 0.02 * jax.random.normal(k_w2, (F, H), dtype=jnp.float32)
    b2 = jnp.zeros((H,), dtype=jnp.float32)
    gamma = jnp.ones((H,), dtype=jnp.float32)   # nn.LayerNorm defaults
    beta = jnp.zeros((H,), dtype=jnp.float32)

    out = encoder_head_forward(feat, w_fc, b_fc, w1, b1, w2, b2, gamma, beta)
    out = jax.block_until_ready(out)

    ref = encoder_head_reference(feat, w_fc, b_fc, w1, b1, w2, b2, gamma, beta)
    assert out.shape == (B, S, H) and out.dtype == jnp.float32
    assert bool(jnp.all(jnp.isfinite(out)))
    # Loose tolerance: bf16-operand MXU matmuls vs XLA reference.
    assert jnp.allclose(out, ref, rtol=5e-2, atol=5e-2), "mismatch vs reference"

    print("KERNEL_OK")
</pallas_src>

<mosaic_0001>
module attributes {stable_mosaic.version = 11 : i64} {
  func.func @encoder_head_kernel(%arg0: i32, %arg1: memref<8x256xbf16, #tpu.memory_space<vmem>>, %arg2: memref<256x128xbf16, #tpu.memory_space<vmem>>, %arg3: memref<1x128xf32, #tpu.memory_space<vmem>>, %arg4: memref<128x512xbf16, #tpu.memory_space<vmem>>, %arg5: memref<1x512xf32, #tpu.memory_space<vmem>>, %arg6: memref<512x128xbf16, #tpu.memory_space<vmem>>, %arg7: memref<1x128xf32, #tpu.memory_space<vmem>>, %arg8: memref<1x128xf32, #tpu.memory_space<vmem>>, %arg9: memref<1x128xf32, #tpu.memory_space<vmem>>, %arg10: memref<8x128xf32, #tpu.memory_space<vmem>>) attributes {dimension_semantics = [#tpu.dimension_semantics<parallel>], iteration_bounds = array<i64: 2>, scalar_prefetch = 0 : i64, scratch_operands = 0 : i64, tpu.core_type = #tpu.core_type<tc>, window_params = [{transform_indices = @transform_0, window_bounds = array<i64: 8, 256>}, {pipeline_mode = #tpu.pipeline_mode<synchronous>, transform_indices = @transform_1, window_bounds = array<i64: 256, 128>}, {pipeline_mode = #tpu.pipeline_mode<synchronous>, transform_indices = @transform_2, window_bounds = array<i64: 1, 128>}, {pipeline_mode = #tpu.pipeline_mode<synchronous>, transform_indices = @transform_3, window_bounds = array<i64: 128, 512>}, {pipeline_mode = #tpu.pipeline_mode<synchronous>, transform_indices = @transform_4, window_bounds = array<i64: 1, 512>}, {pipeline_mode = #tpu.pipeline_mode<synchronous>, transform_indices = @transform_5, window_bounds = array<i64: 512, 128>}, {pipeline_mode = #tpu.pipeline_mode<synchronous>, transform_indices = @transform_6, window_bounds = array<i64: 1, 128>}, {pipeline_mode = #tpu.pipeline_mode<synchronous>, transform_indices = @transform_7, window_bounds = array<i64: 1, 128>}, {pipeline_mode = #tpu.pipeline_mode<synchronous>, transform_indices = @transform_8, window_bounds = array<i64: 1, 128>}, {transform_indices = @transform_9, window_bounds = array<i64: 8, 128>}]} {
    %c0 = arith.constant 0 : index
    %c0_0 = arith.constant 0 : index
    %0 = vector.load %arg8[%c0, %c0_0] : memref<1x128xf32, #tpu.memory_space<vmem>>, vector<1x128xf32>
    %c0_1 = arith.constant 0 : index
    %c0_2 = arith.constant 0 : index
    %1 = vector.load %arg9[%c0_1, %c0_2] : memref<1x128xf32, #tpu.memory_space<vmem>>, vector<1x128xf32>
    %c0_3 = arith.constant 0 : index
    %c0_4 = arith.constant 0 : index
    %2 = vector.load %arg1[%c0_3, %c0_4] : memref<8x256xbf16, #tpu.memory_space<vmem>>, vector<8x256xbf16>
    %c0_5 = arith.constant 0 : index
    %c0_6 = arith.constant 0 : index
    %3 = vector.load %arg2[%c0_5, %c0_6] : memref<256x128xbf16, #tpu.memory_space<vmem>>, vector<256x128xbf16>
    %cst = arith.constant dense<0.000000e+00> : vector<8x128xf32>
    %4 = tpu.matmul %2, %3, %cst {dimension_numbers = #tpu.dot_dimension_numbers<[1], [0], [0], [1], [0, 0, 1, 1], [], []>} : vector<8x256xbf16>, vector<256x128xbf16>, vector<8x128xf32> -> vector<8x128xf32>
    %c0_7 = arith.constant 0 : index
    %c0_8 = arith.constant 0 : index
    %5 = vector.load %arg3[%c0_7, %c0_8] : memref<1x128xf32, #tpu.memory_space<vmem>>, vector<1x128xf32>
    %6 = vector.broadcast %5 : vector<1x128xf32> to vector<8x128xf32>
    %7 = arith.addf %4, %6 : vector<8x128xf32>
    %cst_9 = arith.constant 5.000000e-01 : f32
    %8 = vector.broadcast %cst_9 : f32 to vector<8x128xf32>
    %9 = arith.mulf %8, %7 : vector<8x128xf32>
    %cst_10 = arith.constant 4.471500e-02 : f32
    %10 = vector.broadcast %cst_10 : f32 to vector<8x128xf32>
    %11 = arith.mulf %10, %7 : vector<8x128xf32>
    %12 = arith.mulf %11, %7 : vector<8x128xf32>
    %13 = arith.mulf %12, %7 : vector<8x128xf32>
    %14 = arith.addf %7, %13 : vector<8x128xf32>
    %cst_11 = arith.constant 0.797884583 : f32
    %15 = vector.broadcast %cst_11 : f32 to vector<8x128xf32>
    %16 = arith.mulf %15, %14 : vector<8x128xf32>
    %17 = math.tanh %16 : vector<8x128xf32>
    %cst_12 = arith.constant 1.000000e+00 : f32
    %18 = vector.broadcast %cst_12 : f32 to vector<8x128xf32>
    %19 = arith.addf %18, %17 : vector<8x128xf32>
    %20 = arith.mulf %9, %19 : vector<8x128xf32>
    %cst_13 = arith.constant dense<0.000000e+00> : vector<8xf32>
    %21 = vector.multi_reduction <add>, %20, %cst_13 [1] : vector<8x128xf32> to vector<8xf32>
    %22 = vector.shape_cast %21 : vector<8xf32> to vector<8x1xf32>
    %cst_14 = arith.constant 1.280000e+02 : f32
    %23 = vector.broadcast %cst_14 : f32 to vector<8x1xf32>
    %24 = arith.divf %22, %23 : vector<8x1xf32>
    %25 = vector.broadcast %24 : vector<8x1xf32> to vector<8x128xf32>
    %26 = arith.subf %20, %25 : vector<8x128xf32>
    %27 = arith.mulf %26, %26 : vector<8x128xf32>
    %cst_15 = arith.constant dense<0.000000e+00> : vector<8xf32>
    %28 = vector.multi_reduction <add>, %27, %cst_15 [1] : vector<8x128xf32> to vector<8xf32>
    %29 = vector.shape_cast %28 : vector<8xf32> to vector<8x1xf32>
    %cst_16 = arith.constant 1.280000e+02 : f32
    %30 = vector.broadcast %cst_16 : f32 to vector<8x1xf32>
    %31 = arith.divf %29, %30 : vector<8x1xf32>
    %32 = vector.broadcast %24 : vector<8x1xf32> to vector<8x128xf32>
    %33 = arith.subf %20, %32 : vector<8x128xf32>
    %cst_17 = arith.constant 9.99999974E-6 : f32
    %34 = vector.broadcast %cst_17 : f32 to vector<8x1xf32>
    %35 = arith.addf %31, %34 : vector<8x1xf32>
    %36 = math.rsqrt %35 : vector<8x1xf32>
    %37 = vector.broadcast %36 : vector<8x1xf32> to vector<8x128xf32>
    %38 = arith.mulf %33, %37 : vector<8x128xf32>
    %39 = vector.broadcast %0 : vector<1x128xf32> to vector<8x128xf32>
    %40 = arith.mulf %38, %39 : vector<8x128xf32>
    %41 = vector.broadcast %1 : vector<1x128xf32> to vector<8x128xf32>
    %42 = arith.addf %40, %41 : vector<8x128xf32>
    %43 = arith.truncf %42 : vector<8x128xf32> to vector<8x128xbf16>
    %cst_18 = arith.constant 0.000000e+00 : f32
    %44 = vector.broadcast %cst_18 : f32 to vector<8x128xf32>
    %c0_19 = arith.constant 0 : index
    %c0_20 = arith.constant 0 : index
    %45 = vector.load %arg4[%c0_19, %c0_20] : memref<128x512xbf16, #tpu.memory_space<vmem>>, vector<128x512xbf16>
    %cst_21 = arith.constant dense<0.000000e+00> : vector<8x512xf32>
    %46 = tpu.matmul %43, %45, %cst_21 {dimension_numbers = #tpu.dot_dimension_numbers<[1], [0], [0], [1], [0, 0, 1, 1], [], []>} : vector<8x128xbf16>, vector<128x512xbf16>, vector<8x512xf32> -> vector<8x512xf32>
    %c0_22 = arith.constant 0 : index
    %c0_23 = arith.constant 0 : index
    %47 = vector.load %arg5[%c0_22, %c0_23] : memref<1x512xf32, #tpu.memory_space<vmem>>, vector<1x512xf32>
    %48 = vector.broadcast %47 : vector<1x512xf32> to vector<8x512xf32>
    %49 = arith.addf %46, %48 : vector<8x512xf32>
    %cst_24 = arith.constant 5.000000e-01 : f32
    %50 = vector.broadcast %cst_24 : f32 to vector<8x512xf32>
    %51 = arith.mulf %50, %49 : vector<8x512xf32>
    %cst_25 = arith.constant 4.471500e-02 : f32
    %52 = vector.broadcast %cst_25 : f32 to vector<8x512xf32>
    %53 = arith.mulf %52, %49 : vector<8x512xf32>
    %54 = arith.mulf %53, %49 : vector<8x512xf32>
    %55 = arith.mulf %54, %49 : vector<8x512xf32>
    %56 = arith.addf %49, %55 : vector<8x512xf32>
    %cst_26 = arith.constant 0.797884583 : f32
    %57 = vector.broadcast %cst_26 : f32 to vector<8x512xf32>
    %58 = arith.mulf %57, %56 : vector<8x512xf32>
    %59 = math.tanh %58 : vector<8x512xf32>
    %cst_27 = arith.constant 1.000000e+00 : f32
    %60 = vector.broadcast %cst_27 : f32 to vector<8x512xf32>
    %61 = arith.addf %60, %59 : vector<8x512xf32>
    %62 = arith.mulf %51, %61 : vector<8x512xf32>
    %63 = arith.truncf %62 : vector<8x512xf32> to vector<8x512xbf16>
    %c0_28 = arith.constant 0 : index
    %c0_29 = arith.constant 0 : index
    %64 = vector.load %arg6[%c0_28, %c0_29] : memref<512x128xbf16, #tpu.memory_space<vmem>>, vector<512x128xbf16>
    %cst_30 = arith.constant dense<0.000000e+00> : vector<8x128xf32>
    %65 = tpu.matmul %63, %64, %cst_30 {dimension_numbers = #tpu.dot_dimension_numbers<[1], [0], [0], [1], [0, 0, 1, 1], [], []>} : vector<8x512xbf16>, vector<512x128xbf16>, vector<8x128xf32> -> vector<8x128xf32>
    %66 = arith.addf %44, %65 : vector<8x128xf32>
    %c0_31 = arith.constant 0 : index
    %c0_32 = arith.constant 0 : index
    %67 = vector.load %arg7[%c0_31, %c0_32] : memref<1x128xf32, #tpu.memory_space<vmem>>, vector<1x128xf32>
    %68 = vector.broadcast %67 : vector<1x128xf32> to vector<8x128xf32>
    %69 = arith.addf %66, %68 : vector<8x128xf32>
    %cst_33 = arith.constant dense<0.000000e+00> : vector<8xf32>
    %70 = vector.multi_reduction <add>, %69, %cst_33 [1] : vector<8x128xf32> to vector<8xf32>
    %71 = vector.shape_cast %70 : vector<8xf32> to vector<8x1xf32>
    %cst_34 = arith.constant 1.280000e+02 : f32
    %72 = vector.broadcast %cst_34 : f32 to vector<8x1xf32>
    %73 = arith.divf %71, %72 : vector<8x1xf32>
    %74 = vector.broadcast %73 : vector<8x1xf32> to vector<8x128xf32>
    %75 = arith.subf %69, %74 : vector<8x128xf32>
    %76 = arith.mulf %75, %75 : vector<8x128xf32>
    %cst_35 = arith.constant dense<0.000000e+00> : vector<8xf32>
    %77 = vector.multi_reduction <add>, %76, %cst_35 [1] : vector<8x128xf32> to vector<8xf32>
    %78 = vector.shape_cast %77 : vector<8xf32> to vector<8x1xf32>
    %cst_36 = arith.constant 1.280000e+02 : f32
    %79 = vector.broadcast %cst_36 : f32 to vector<8x1xf32>
    %80 = arith.divf %78, %79 : vector<8x1xf32>
    %81 = vector.broadcast %73 : vector<8x1xf32> to vector<8x128xf32>
    %82 = arith.subf %69, %81 : vector<8x128xf32>
    %cst_37 = arith.constant 9.99999974E-6 : f32
    %83 = vector.broadcast %cst_37 : f32 to vector<8x1xf32>
    %84 = arith.addf %80, %83 : vector<8x1xf32>
    %85 = math.rsqrt %84 : vector<8x1xf32>
    %86 = vector.broadcast %85 : vector<8x1xf32> to vector<8x128xf32>
    %87 = arith.mulf %82, %86 : vector<8x128xf32>
    %88 = vector.broadcast %0 : vector<1x128xf32> to vector<8x128xf32>
    %89 = arith.mulf %87, %88 : vector<8x128xf32>
    %90 = vector.broadcast %1 : vector<1x128xf32> to vector<8x128xf32>
    %91 = arith.addf %89, %90 : vector<8x128xf32>
    %c0_38 = arith.constant 0 : index
    %c0_39 = arith.constant 0 : index
    %92 = vector.load %arg10[%c0_38, %c0_39] : memref<8x128xf32, #tpu.memory_space<vmem>>, vector<8x128xf32>
    tpu.vector_store %arg10[%c0_38, %c0_39], %91 {strides = array<i32>} : memref<8x128xf32, #tpu.memory_space<vmem>>, vector<8x128xf32>,
    return
  }
  func.func @transform_0(%arg0: i32) -> (i32, i32) {
    %c0_i32 = arith.constant 0 : i32
    %c0_i32_0 = arith.constant 0 : i32
    return %arg0, %c0_i32 : i32, i32
  }
  func.func @transform_1(%arg0: i32) -> (i32, i32) {
    %c0_i32 = arith.constant 0 : i32
    %c0_i32_0 = arith.constant 0 : i32
    %c0_i32_1 = arith.constant 0 : i32
    return %c0_i32, %c0_i32_0 : i32, i32
  }
  func.func @transform_2(%arg0: i32) -> (i32, i32) {
    %c0_i32 = arith.constant 0 : i32
    %c0_i32_0 = arith.constant 0 : i32
    %c0_i32_1 = arith.constant 0 : i32
    return %c0_i32, %c0_i32_0 : i32, i32
  }
  func.func @transform_3(%arg0: i32) -> (i32, i32) {
    %c0_i32 = arith.constant 0 : i32
    %c0_i32_0 = arith.constant 0 : i32
    %c0_i32_1 = arith.constant 0 : i32
    return %c0_i32, %c0_i32_0 : i32, i32
  }
  func.func @transform_4(%arg0: i32) -> (i32, i32) {
    %c0_i32 = arith.constant 0 : i32
    %c0_i32_0 = arith.constant 0 : i32
    %c0_i32_1 = arith.constant 0 : i32
    return %c0_i32, %c0_i32_0 : i32, i32
  }
  func.func @transform_5(%arg0: i32) -> (i32, i32) {
    %c0_i32 = arith.constant 0 : i32
    %c0_i32_0 = arith.constant 0 : i32
    %c0_i32_1 = arith.constant 0 : i32
    return %c0_i32, %c0_i32_0 : i32, i32
  }
  func.func @transform_6(%arg0: i32) -> (i32, i32) {
    %c0_i32 = arith.constant 0 : i32
    %c0_i32_0 = arith.constant 0 : i32
    %c0_i32_1 = arith.constant 0 : i32
    return %c0_i32, %c0_i32_0 : i32, i32
  }
  func.func @transform_7(%arg0: i32) -> (i32, i32) {
    %c0_i32 = arith.constant 0 : i32
    %c0_i32_0 = arith.constant 0 : i32
    %c0_i32_1 = arith.constant 0 : i32
    return %c0_i32, %c0_i32_0 : i32, i32
  }
  func.func @transform_8(%arg0: i32) -> (i32, i32) {
    %c0_i32 = arith.constant 0 : i32
    %c0_i32_0 = arith.constant 0 : i32
    %c0_i32_1 = arith.constant 0 : i32
    return %c0_i32, %c0_i32_0 : i32, i32
  }
  func.func @transform_9(%arg0: i32) -> (i32, i32) {
    %c0_i32 = arith.constant 0 : i32
    %c0_i32_0 = arith.constant 0 : i32
    return %arg0, %c0_i32 : i32, i32
  }
}

</mosaic_0001>

<bundles_post_ra>
// kernel: tpu_custom_call.1
= control target key start
LH: loop header
LB: loop body
LE: loop exit
PB: predicated region body
PF: predicated region fallthrough
CT: control target
= control target key end

     0   :  { %s2405_s0 = inlined_call_operand.hbm [shape: bf16[16,256], index: 0, kind: input, shape index: {}]   ;;  %s2406_s1 = inlined_call_operand.hbm [shape: bf16[256,128], index: 1, kind: input, shape index: {}]   ;;  %s2407_s2 = inlined_call_operand.vmem [shape: f32[1,128], index: 2, kind: input, shape index: {}]   ;;  %s2408_s3 = inlined_call_operand.hbm [shape: bf16[128,512], index: 3, kind: input, shape index: {}]   ;;  %s2409_s4 = inlined_call_operand.hbm [shape: f32[1,512], index: 4, kind: input, shape index: {}]   ;;  %s2410_s5 = inlined_call_operand.hbm [shape: bf16[512,128], index: 5, kind: input, shape index: {}]   ;;  %s2411_s6 = inlined_call_operand.vmem [shape: f32[1,128], index: 6, kind: input, shape index: {}]   ;;  %s2412_s7 = inlined_call_operand.vmem [shape: f32[1,128], index: 7, kind: input, shape index: {}]   ;;  %s2413_s8 = inlined_call_operand.vmem [shape: f32[1,128], index: 8, kind: input, shape index: {}]   ;;  %s2414_s9 = inlined_call_operand.hbm [shape: f32[16,128], index: 9, kind: output, shape index: {}]  }
   0x1   :  { %2415 = sst [smem:[#allocation16_spill]] %s2406_s1 }
   0x2   :  { %2416 = sst [smem:[#allocation17_spill]] %s2408_s3 }
   0x3   :  { %2417 = sst [smem:[#allocation18_spill]] %s2409_s4 }
   0x4   :  { %2418 = sst [smem:[#allocation19_spill]] %s2410_s5 }
   0x5   :  { %14 = vsyncpa [#allocation3], 0 }
   0x6   :  { %16 = vsyncpa [#allocation3 + $0x1], 0 }
   0x7   :  { %17 = vsyncpa [#allocation6], 0 }
   0x8   :  { %18 = vsyncpa [#allocation9], 0 }
   0x9   :  { %19 = vsyncpa [#allocation4], 0 }
   0xa   :  { %21 = vsyncpa [#allocation4 + $0x1], 0  ;;  %s2200_s30 = smov 0   ;;  %s2202_s10 = smov 0  }
   0xb   :  { %s2204_s11 = smov 0   ;;  %s2206_s12 = smov 0  }
   0xc LB: > { %s2419_s1 = sld [smem:[#allocation16_spill]]  ;;  %s2224_s16 = sadd.s32 4294967295, %s2139_s12   ;;  %s2139_s12 = sphi %s2206_s12, %s2434_s12   ;;  %s2135_s11 = sphi %s2204_s11, %s2433_s11   ;;  %s2131_s10 = sphi %s2202_s10, %s2432_s10   ;;  %s2127_s30 = sphi %s2200_s30, %s2431_s30  }
   0xd   : > { %p1382_p0 = scmp.ge.s32.totalorder %s2139_s12, 1  ;;  %p48_p1 = scmp.eq.s32.totalorder %s2224_s16, 0 }
   0xe   : > { %p252_p2 = scmp.lt.s32.totalorder %s2139_s12, 3  ;;  %s2141_s18 = smov [#allocation5]  }
   0xf   : > { %s265_s19 = sshll.u32 %s2141_s18, 4  ;;  %s2421_s4 = sld [smem:[#allocation18_spill]]  ;;  %s266_s19 = int_to_ptr.vmem [resolvable:$true] %s265_s19 }
  0x10   : > { %p2229_p3 = pnand %p1382_p0, %p252_p2  ;;  %s2423_s3 = sld [smem:[#allocation17_spill]] }
  0x11   : > { %s2142_s27 = smov [#allocation8]   ;;  %s2143_s29 = smov 64  }
  0x12   : > { %s263_s15 = sshll.u32 %s2419_s1, 4  ;;  %p1823_p4 = pneg %p2229_p3  ;;  %s264_s15 = int_to_ptr.hbm [resolvable:$true] %s263_s15 }
  0x13   : > { %s297_s28 = sshll.u32 %s2142_s27, 4  ;;  %s2144_s13 = smov 4   ;;  %s298_s28 = int_to_ptr.vmem [resolvable:$true] %s297_s28 }
  0x14   : > { %p2241_p6 = pnand %p1823_p4, %p48_p1  ;;  %s2145_s14 = smov [#allocation7]  }
  0x15   : > { %s295_s22 = sshll.u32 %s2421_s4, 4  ;;  %s282_s18 = sshll.u32 %s2145_s14, 4  ;;  %s296_s22 = int_to_ptr.hbm [resolvable:$true] %s295_s22  ;;  %s283_s18 = int_to_ptr.vmem [resolvable:$true] %s282_s18 }
  0x16   : > { %s280_s26 = sshll.u32 %s2423_s3, 4  ;;  %s2424_s5 = sld [smem:[#allocation19_spill]]  ;;  %s281_s26 = int_to_ptr.hbm [resolvable:$true] %s280_s26 }
  0x17   : > { %1826 = dma.hbm_to_vmem [thread:$0]  (!%p2241_p6), %s264_s15, 2048, %s266_s19, [#allocation6], %s2143_s29, %s2143_s29, %s2144_s13  }
  0x18   : > { %1832 = dma.hbm_to_vmem [thread:$0]  (!%p2241_p6), %s296_s22, 64, %s298_s28, [#allocation9]  }
  0x19   : > { %s2146_s15 = smov 256   ;;  %s2147_s19 = smov 16  }
  0x1a   : > { %1829 = dma.hbm_to_vmem [thread:$0]  (!%p2241_p6), %s281_s26, 4096, %s283_s18, [#allocation6], %s2146_s15, %s2146_s15, %s2147_s19  }
  0x1b   : > { %s2148_s22 = smov [#allocation10]   ;;  %s1381_s27 = sadd.s32 4294967294, %s2139_s12  }
  0x1c   : > { %s306_s24 = sshll.u32 %s2424_s5, 4  ;;  %s308_s25 = sshll.u32 %s2148_s22, 4  ;;  %s307_s24 = int_to_ptr.hbm [resolvable:$true] %s306_s24  ;;  %s309_s25 = int_to_ptr.vmem [resolvable:$true] %s308_s25 }
  0x1d   : > { %1835 = dma.hbm_to_vmem [thread:$0]  (!%p2241_p6), %s307_s24, 4096, %s309_s25, [#allocation9], %s2143_s29, %s2143_s29, %s2144_s13  }
  0x1e   : > { %s2261_s28 = sadd.s32 1, %s2139_s12   ;;  %s34_s20 = sadd.s32 1, %s2135_s11 }
  0x1f   : > { %s31_s14 = ssub.s32 %s2139_s12, %s2261_s28  ;;  %p41_p8 = scmp.ne.s32.totalorder %s2135_s11, %s2131_s10 }
  0x20   : > { %p32_p7 = scmp.eq.s32.totalorder %s31_s14, 0  ;;  %p42_p9 = scmp.eq.s32.totalorder %s2139_s12, 0 }
  0x21   : > { %p47_p10 = scmp.ne.s32.totalorder %s2131_s10, %s2127_s30  ;;  %p239_p13 = scmp.eq.s32.totalorder %s2224_s16, 1 }
  0x22   : > { %s2272_s26 = scalar_select %p32_p7, %s2135_s11, %s34_s20  }
  0x23   : > { %p2274_p11 = por %p42_p9, %p41_p8  ;;  %p2280_p12 = por %p48_p1, %p47_p10 }
  0x24   : > { %p245_p0 = scmp.eq.s32.totalorder %s1381_s27, 1  ;;  %p1848_p2 = scmp.lt.s32.totalorder %s2139_s12, 2 }
  0x25   : > { %s331_s29 = sand.u32 1, %s2135_s11   ;;  %p2287_p4 = por %p239_p13, %p41_p8 }
  0x26   : > { %p2291_p6 = por %p245_p0, %p47_p10  ;;  %s1388_s24 = sshll.u32 %s331_s29, 3 }
  0x27   : > { %s1722_s15 = sshll.u32 %s2139_s12, 3  ;;  %s335_s14 = scalar_lea.vmem [#allocation2], %s1388_s24 }
  0x28   : > { %s340_s25 = scalar_lea.hbm %s2405_s0, %s1722_s15  ;;  %s344_s20 = sshll.u32 %s335_s14, 4  ;;  %s345_s20 = int_to_ptr.vmem [resolvable:$true] %s344_s20 }
  0x29   : > { %s342_s1 = sshll.u32 %s340_s25, 4  ;;  %p2301_p7 = pnand %p1848_p2, %p2274_p11  ;;  %s343_s1 = int_to_ptr.hbm [resolvable:$true] %s342_s1 }
  0x2a   : > { %s332_s3 = scalar_lea.sflag [#allocation3], %s331_s29  ;;  %s2035_s4 = sshra.s32 %s343_s1, 4  ;;  %s2036_s4 = int_to_ptr.hbm [resolvable:$true] %s2035_s4 }
  0x2b   : > { %s2037_s5 = scalar_lea.hbm %s2036_s4, 8  ;;  %p2039_p9 = pneg %p2301_p7 }
  0x2c   : > { %p2038_p8 = scmp.ne.s32.totalorder %s2036_s4, %s2037_s5  ;;  %s2042_s19 = scalar_lea.hbm %s2405_s0, 16 }
  0x2d   : > { %p2043_p11 = scmp.lt.s32.totalorder %s2036_s4, %s2405_s0  ;;  %p2044_p0 = scmp.lt.s32.totalorder %s2042_s19, %s2037_s5 }
  0x2e   : > { %p2040_p10 = pnand %p2039_p9, %p2038_p8 }
  0x2f   : > { %p2045_p2 = por %p2044_p0, %p2043_p11 }
  0x30   : > { %p2041_p13 = pneg %p2040_p10 }
  0x32   : > { %p2046_p5 = pnand %p2045_p2, %p2041_p13 }
  0x34   : > { %2049 = shalt.err (!%p2046_p5)
}
  0x35   : > { %1839 = dma.hbm_to_vmem [thread:$0]  (!%p2301_p7), %s343_s1, 128, %s345_s20, %s332_s3  }
  0x36   : > { %353 = sbr.rel (%p2229_p3) target bundleno = 1081 (0x439), region = 56  ;;  %s2318_s29 = sand.u32 (!%p2229_p3), 1, %s2131_s10  }
  0x37   : > { %s1392_s25 = sshll.u32 (!%p2229_p3), %s2318_s29, 3  ;;  %s356_s14 = scalar_lea.sflag (!%p2229_p3), [#allocation3], %s2318_s29 }
  0x38   : > { %s2324_s4 = scalar_lea.vmem (!%p2229_p3), [#allocation2], %s1392_s25 }
  0x3b   : > { %2110 = dma.done.wait (%p2280_p12), %s356_s14, 128  }
  0x3c   : > { %2112 = vsyncadd (%p2280_p12), %s356_s14, 4294967168 }
  0x3d   : > { %2114 = dma.done.wait (%p48_p1), [#allocation6], 6144  }
  0x3e   : > { %2116 = vsyncadd (%p48_p1), [#allocation6], 4294961152 }
  0x3f   : > { %2118 = dma.done.wait (%p48_p1), [#allocation9], 4160  }
  0x40   : > { %2120 = vsyncadd (%p48_p1), [#allocation9], 4294963136  ;;  %v1730_v0 = vld [vmem:[#allocation5 + $0x38] sm:$0xff]  ;;  %v1729_v2 = vld [vmem:[#allocation5 + $0x30] sm:$0xff]  ;;  %v2149_v37 = vmov 128.0   ;;  %s1719_s15 = sshll.u32 %s2224_s16, 3 }
  0x41   : > { %v1738_v1 = vld [vmem:[#allocation5 + $0x78] sm:$0xff]  ;;  %557 = vmatpush.bf16.msra.mxu0 %v1730_v0  ;;  %v1737_v3 = vld [vmem:[#allocation5 + $0x70] sm:$0xff]  ;;  %v1728_v4 = vld [vmem:[#allocation5 + $0x28] sm:$0xff]  ;;  %s1268_s18 = scalar_lea.hbm %s2414_s9, %s1719_s15  ;;  %s414_s14 = scalar_lea.vmem [#allocation11], %s1392_s25 }
  0x42   : > { %570 = vmatpush.bf16.msra.mxu1 %v1738_v1  ;;  %v1736_v5 = vld [vmem:[#allocation5 + $0x68] sm:$0xff]  ;;  %v1727_v6 = vld [vmem:[#allocation5 + $0x20] sm:$0xff]  ;;  %v1726_v8 = vld [vmem:[#allocation5 + $0x18] sm:$0xff]  ;;  %s1272_s1 = sshll.u32 %s1268_s18, 4  ;;  %s1258_s16 = scalar_lea.sflag [#allocation4], %s2318_s29  ;;  %s1273_s1 = int_to_ptr.hbm [resolvable:$true] %s1272_s1 }
  0x43   : > { %v1735_v7 = vld [vmem:[#allocation5 + $0x60] sm:$0xff]  ;;  %v1734_v9 = vld [vmem:[#allocation5 + $0x58] sm:$0xff]  ;;  %v1725_v10 = vld [vmem:[#allocation5 + $0x10] sm:$0xff]  ;;  %s2079_s3 = sshra.s32 %s1273_s1, 4  ;;  %s2085_s25 = scalar_lea.hbm %s2414_s9, 16  ;;  %s2080_s3 = int_to_ptr.hbm [resolvable:$true] %s2079_s3 }
  0x44   : > { %v1733_v11 = vld [vmem:[#allocation5 + $0x50] sm:$0xff]  ;;  %v1724_v12 = vld [vmem:[#allocation5 + $0x8] sm:$0xff]  ;;  %v1723_v17 = vld [vmem:[#allocation5] sm:$0xff]  ;;  %s2081_s5 = scalar_lea.hbm %s2080_s3, 8  ;;  %p2086_p12 = scmp.lt.s32.totalorder %s2080_s3, %s2414_s9 }
  0x45   : > { %558 = vmatpush.bf16.msra.mxu0 %v1729_v2  ;;  %v1732_v13 = vld [vmem:[#allocation5 + $0x48] sm:$0xff]  ;;  %v417_v14 = vld [vmem:[%s2324_s4] sm:$0xff]  ;;  %v1731_v18 = vld [vmem:[#allocation5 + $0x40] sm:$0xff]  ;;  %s1270_s4 = sshll.u32 %s414_s14, 4  ;;  %p2082_p1 = scmp.ne.s32.totalorder %s2080_s3, %s2081_s5  ;;  %s1271_s4 = int_to_ptr.vmem [resolvable:$true] %s1270_s4 }
  0x46   : > { %571 = vmatpush.bf16.msra.mxu1 %v1737_v3  ;;  %v455_v15 = vunpack.c.l.b16 %v417_v14  ;;  %v456_v16 = vunpack.c.h.b16 %v417_v14  ;;  %v1895_v21 = vld [vmem:[%s2407_s2] ss:$0 sm:$0xff]  ;;  %v1576_v38 = vld [vmem:[#allocation7 + $0xe0] sm:$0xf]  ;;  %v1767_v40 = vld [vmem:[#allocation7 + $0xe4] sm:$0xf]  ;;  %p2087_p7 = scmp.lt.s32.totalorder %s2085_s25, %s2081_s5 }
  0x47   : > { %v1769_v39 = vld [vmem:[#allocation7 + $0xec] sm:$0xf0]  ;;  %v1578_v42 = vld [vmem:[#allocation7 + $0xf0] sm:$0xf0]  ;;  %v1584_v43 = vld [vmem:[#allocation7 + $0xe8] sm:$0xf]  ;;  %p2083_p3 = pnand %p2082_p1, %p2287_p4 }
  0x48   : > { %v457_v19 = vpack.c.b16 %v455_v15, %v455_v15  ;;  %v458_v20 = vpack.c.b16 %v456_v16, %v456_v16  ;;  %v1577_v41 = vor.u32 %v1769_v39, %v1576_v38  ;;  %v1770_v44 = vld [vmem:[#allocation7 + $0xf4] sm:$0xf0]  ;;  %v1581_v45 = vor.u32 %v1767_v40, %v1578_v42  ;;  %v1768_v47 = vld [vmem:[#allocation7 + $0xec] sm:$0xf]  ;;  %v1586_v48 = vld [vmem:[#allocation7 + $0xf8] sm:$0xf0]  ;;  %p2088_p8 = por %p2087_p7, %p2086_p12 }
  0x49   : > { %559 = vmatpush.bf16.msra.mxu0 %v1728_v4  ;;  %v1585_v46 = vor.u32 %v1770_v44, %v1584_v43  ;;  %v1589_v49 = vor.u32 %v1768_v47, %v1586_v48  ;;  %v1560_v60 = vld [vmem:[#allocation7 + $0xc0] sm:$0xf]  ;;  %v1765_v61 = vld [vmem:[#allocation7 + $0xcc] sm:$0xf0]  ;;  %v1763_v62 = vld [vmem:[#allocation7 + $0xc4] sm:$0xf]  ;;  %p2084_p5 = pneg %p2083_p3 }
  0x4a   : > { %572 = vmatpush.bf16.msra.mxu1 %v1736_v5  ;;  %830 = vmatpush.bf16.msra.mxu2 %v1577_v41  ;;  %v1561_v63 = vor.u32 %v1765_v61, %v1560_v60  ;;  %v1562_v0 = vld [vmem:[#allocation7 + $0xd0] sm:$0xf0]  ;;  %v1568_v1 = vld [vmem:[#allocation7 + $0xc8] sm:$0xf]  ;;  %v1766_v2 = vld [vmem:[#allocation7 + $0xd4] sm:$0xf0] }
  0x4b   : > { %843 = vmatpush.bf16.msra.mxu3 %v1581_v45  ;;  %v1565_v3 = vor.u32 %v1763_v62, %v1562_v0  ;;  %v1569_v4 = vor.u32 %v1766_v2, %v1568_v1  ;;  %v1764_v5 = vld [vmem:[#allocation7 + $0xcc] sm:$0xf]  ;;  %v1762_v14 = vld [vmem:[#allocation7 + $0xb4] sm:$0xf0]  ;;  %v1522_v42 = vld [vmem:[#allocation7 + $0x78] sm:$0xf0]  ;;  %p2089_p9 = pnand %p2088_p8, %p2084_p5 }
  0x4c   : > { %v1754_v38 = vld [vmem:[#allocation7 + $0x74] sm:$0xf0]  ;;  %v1752_v41 = vld [vmem:[#allocation7 + $0x6c] sm:$0xf]  ;;  %v1496_v44 = vld [vmem:[#allocation7 + $0x40] sm:$0xf] }
  0x4d   : > { %560 = vmatpush.bf16.msra.mxu0 %v1727_v6  ;;  %v1570_v6 = vld [vmem:[#allocation7 + $0xd8] sm:$0xf0]  ;;  %v1525_v43 = vor.u32 %v1752_v41, %v1522_v42  ;;  %v1749_v45 = vld [vmem:[#allocation7 + $0x4c] sm:$0xf0]  ;;  %v1498_v48 = vld [vmem:[#allocation7 + $0x50] sm:$0xf0] }
  0x4e   : > { %573 = vmatpush.bf16.msra.mxu1 %v1735_v7  ;;  %831 = vmatpush.bf16.msra.mxu2 %v1561_v63  ;;  %v1573_v7 = vor.u32 %v1764_v5, %v1570_v6  ;;  %v1497_v47 = vor.u32 %v1749_v45, %v1496_v44  ;;  %v1743_v60 = vld [vmem:[#allocation7 + $0x24] sm:$0xf]  ;;  %v1482_v62 = vld [vmem:[#allocation7 + $0x30] sm:$0xf0]  ;;  %v1488_v63 = vld [vmem:[#allocation7 + $0x28] sm:$0xf] }
  0x4f   : > { %844 = vmatpush.bf16.msra.mxu3 %v1565_v3  ;;  %v1746_v0 = vld [vmem:[#allocation7 + $0x34] sm:$0xf0]  ;;  %v1485_v1 = vor.u32 %v1743_v60, %v1482_v62  ;;  %v1744_v3 = vld [vmem:[#allocation7 + $0x2c] sm:$0xf]  ;;  %v1464_v5 = vld [vmem:[#allocation7] sm:$0xf] }
  0x50   : > { %v1489_v2 = vor.u32 %v1746_v0, %v1488_v63  ;;  %v1777_v41 = vld [vmem:[#allocation10 + $0x30] sm:$0xff]  ;;  %v1799_v44 = vld [vmem:[#allocation10 + $0xe0] sm:$0xff]  ;;  %v1776_v45 = vld [vmem:[#allocation10 + $0x28] sm:$0xff] }
  0x51   : > { %561 = vmatpush.bf16.msra.mxu0 %v1726_v8  ;;  %v1544_v8 = vld [vmem:[#allocation7 + $0xa0] sm:$0xf]  ;;  %v1785_v42 = vld [vmem:[#allocation10 + $0x70] sm:$0xff]  ;;  %v1795_v62 = vld [vmem:[#allocation10 + $0xc0] sm:$0xff] }
  0x52   : > { %574 = vmatpush.bf16.msra.mxu1 %v1734_v9  ;;  %v1761_v9 = vld [vmem:[#allocation7 + $0xac] sm:$0xf0]  ;;  %v1781_v60 = vld [vmem:[#allocation10 + $0x50] sm:$0xff] }
  0x53   : > { %v1772_v63 = vld [vmem:[#allocation10 + $0x8] sm:$0xff] }
  0x54   : > { %v1780_v0 = vld [vmem:[#allocation10 + $0x48] sm:$0xff] }
  0x55   : > { %562 = vmatpush.bf16.msra.mxu0 %v1725_v10  ;;  %v1759_v10 = vld [vmem:[#allocation7 + $0xa4] sm:$0xf] }
  0x56   : > { %575 = vmatpush.bf16.msra.mxu1 %v1733_v11  ;;  %v1545_v11 = vor.u32 %v1761_v9, %v1544_v8  ;;  %v1739_v8 = vld [vmem:[#allocation7 + $0x4] sm:$0xf]  ;;  %v1466_v9 = vld [vmem:[#allocation7 + $0x10] sm:$0xf0] }
  0x58   : > { %832 = vmatpush.bf16.msra.mxu2 %v1545_v11  ;;  %v1469_v11 = vor.u32 %v1739_v8, %v1466_v9 }
  0x59   : > { %563 = vmatpush.bf16.msra.mxu0 %v1724_v12  ;;  %v1546_v12 = vld [vmem:[#allocation7 + $0xb0] sm:$0xf0] }
  0x5a   : > { %576 = vmatpush.bf16.msra.mxu1 %v1732_v13  ;;  %v1552_v13 = vld [vmem:[#allocation7 + $0xa8] sm:$0xf]  ;;  %v1549_v15 = vor.u32 %v1759_v10, %v1546_v12 }
  0x5b   : > { %v1553_v16 = vor.u32 %v1762_v14, %v1552_v13  ;;  %v1472_v12 = vld [vmem:[#allocation7 + $0x8] sm:$0xf]  ;;  %v1742_v13 = vld [vmem:[#allocation7 + $0x14] sm:$0xf0]  ;;  %v1740_v14 = vld [vmem:[#allocation7 + $0xc] sm:$0xf] }
  0x5c   : > { %845 = vmatpush.bf16.msra.mxu3 %v1549_v15  ;;  %v1473_v15 = vor.u32 %v1742_v13, %v1472_v12 }
  0x5d   : > { %564 = vmatpush.bf16.msra.mxu0 %v1723_v17  ;;  %v1760_v17 = vld [vmem:[#allocation7 + $0xac] sm:$0xf] }
  0x5e   : > { %577 = vmatpush.bf16.msra.mxu1 %v1731_v18  ;;  %v1554_v18 = vld [vmem:[#allocation7 + $0xb8] sm:$0xf0] }
  0x60   : > { %565 = vmatmul.bf16.vlgmr.msra.gmra.mxu0 %v457_v19  ;;  %v1557_v19 = vor.u32 %v1760_v17, %v1554_v18 }
  0x61   : > { %578 = vmatmul.bf16.vlgmr.msra.gmra.mxu1 %v458_v20  ;;  %856 = vmatpush.bf16.msrb.mxu0 %v1585_v46  ;;  %v1528_v20 = vld [vmem:[#allocation7 + $0x80] sm:$0xf]  ;;  %v1747_v46 = vld [vmem:[#allocation7 + $0x44] sm:$0xf] }
  0x62   : > { %869 = vmatpush.bf16.msrb.mxu1 %v1589_v49  ;;  %v1504_v49 = vld [vmem:[#allocation7 + $0x48] sm:$0xf] }
  0x65   : > { %857 = vmatpush.bf16.msrb.mxu0 %v1569_v4  ;;  %v1490_v4 = vld [vmem:[#allocation7 + $0x38] sm:$0xf0] }
  0x66   : > { %870 = vmatpush.bf16.msrb.mxu1 %v1573_v7  ;;  %v1493_v6 = vor.u32 %v1744_v3, %v1490_v4  ;;  %v1741_v7 = vld [vmem:[#allocation7 + $0xc] sm:$0xf0]  ;;  %v1779_v3 = vld [vmem:[#allocation10 + $0x40] sm:$0xff] }
  0x67   : > { %v1465_v10 = vor.u32 %v1741_v7, %v1464_v5 }
  0x69   : > { %858 = vmatpush.bf16.msrb.mxu0 %v1553_v16  ;;  %v1474_v16 = vld [vmem:[#allocation7 + $0x18] sm:$0xf0] }
  0x6a   : > { %871 = vmatpush.bf16.msrb.mxu1 %v1557_v19  ;;  %v1477_v17 = vor.u32 %v1740_v14, %v1474_v16  ;;  %v1794_v19 = vld [vmem:[#allocation10 + $0xb8] sm:$0xff] }
  0xdd   : > { %v566_v22 = vpop.f32.mrf.mxu0 }
  0xde   : > { %v579_v23 = vpop.f32.mrf.mxu1  ;;  %v567_v24 = vadd.f32 %v1895_v21, %v566_v22  ;;  %v1757_v21 = vld [vmem:[#allocation7 + $0x8c] sm:$0xf0]  ;;  %v1755_v22 = vld [vmem:[#allocation7 + $0x84] sm:$0xf] }
  0xe0   : > { %v580_v25 = vadd.f32 %v579_v23, %v567_v24  ;;  %v1529_v23 = vor.u32 %v1757_v21, %v1528_v20  ;;  %v1530_v24 = vld [vmem:[#allocation7 + $0x90] sm:$0xf0]  ;;  %v1802_v20 = vld [vmem:[#allocation10 + $0xf8] sm:$0xff] }
  0xe2   : > { %v584_v26 = vmul.f32 0.044715, %v580_v25  ;;  %v583_v34 = vmul.f32 0.5, %v580_v25  ;;  %833 = vmatpush.bf16.msra.mxu2 %v1529_v23  ;;  %v1801_v23 = vld [vmem:[#allocation10 + $0xf0] sm:$0xff] }
  0xe4   : > { %v585_v27 = vmul.f32 %v584_v26, %v580_v25  ;;  %v1758_v26 = vld [vmem:[#allocation7 + $0x94] sm:$0xf0] }
  0xe5   : > { %v568_v28 = vpop.f32.mrf.mxu0 }
  0xe6   : > { %v581_v29 = vpop.f32.mrf.mxu1  ;;  %v586_v30 = vmul.f32 %v585_v27, %v580_v25  ;;  %v1533_v27 = vor.u32 %v1755_v22, %v1530_v24  ;;  %v1793_v22 = vld [vmem:[#allocation10 + $0xb0] sm:$0xff] }
  0xe7   : > { %v1756_v29 = vld [vmem:[#allocation7 + $0x8c] sm:$0xf] }
  0xe8   : > { %v587_v31 = vadd.f32 %v586_v30, %v580_v25  ;;  %v1536_v25 = vld [vmem:[#allocation7 + $0x88] sm:$0xf]  ;;  %v1538_v30 = vld [vmem:[#allocation7 + $0x98] sm:$0xf0]  ;;  %846 = vmatpush.bf16.msra.mxu3 %v1533_v27 }
  0xe9   : > { %v1537_v28 = vor.u32 %v1758_v26, %v1536_v25 }
  0xea   : > { %v588_v32 = vmul.f32 0.7978846, %v587_v31  ;;  %v1541_v31 = vor.u32 %v1756_v29, %v1538_v30 }
  0xeb   : > { %859 = vmatpush.bf16.msrb.mxu0 %v1537_v28 }
  0xec   : > { %1899 = vtanh.f32 %v588_v32  ;;  %v1512_v32 = vld [vmem:[#allocation7 + $0x60] sm:$0xf]  ;;  %872 = vmatpush.bf16.msrb.mxu1 %v1541_v31  ;;  %v2353_v31 = vld [vmem:[%s2412_s7] ss:$0 sm:$0xff] }
  0xed   : > { %1901 = vrcp.f32 %v2149_v37  ;;  %v1520_v37 = vld [vmem:[#allocation7 + $0x68] sm:$0xf] }
  0xee   : > { %v1521_v40 = vor.u32 %v1754_v38, %v1520_v37  ;;  %v1778_v38 = vld [vmem:[#allocation10 + $0x38] sm:$0xff] }
  0xf0   : > { %860 = vmatpush.bf16.msrb.mxu0 %v1521_v40  ;;  %873 = vmatpush.bf16.msrb.mxu1 %v1525_v43  ;;  %v1792_v40 = vld [vmem:[#allocation10 + $0xa8] sm:$0xff]  ;;  %v1791_v43 = vld [vmem:[#allocation10 + $0xa0] sm:$0xff] }
  0xf2   : > { %v1900_v33 = vpop.eup %1899 }
  0xf3   : > { %v590_v35 = vadd.f32 1.0, %v1900_v33  ;;  %v1902_v50 = vpop.eup %1901  ;;  %v1753_v33 = vld [vmem:[#allocation7 + $0x6c] sm:$0xf0] }
  0xf4   : > { %v595_v51 = vmul.f32 128.0, %v1902_v50  ;;  %vm599_vm0 = vweird.f32 %v1902_v50 }
  0xf5   : > { %v591_v36 = vmul.f32 %v590_v35, %v583_v34  ;;  %v1751_v34 = vld [vmem:[#allocation7 + $0x64] sm:$0xf]  ;;  %v1513_v35 = vor.u32 %v1753_v33, %v1512_v32 }
  0xf6   : > { %v596_v52 = vsub.f32 1.0, %v595_v51  ;;  %v1501_v51 = vor.u32 %v1747_v46, %v1498_v48  ;;  %v1784_v46 = vld [vmem:[#allocation10 + $0x68] sm:$0xff]  ;;  %v1798_v48 = vld [vmem:[#allocation10 + $0xd8] sm:$0xff] }
  0xf7   : > { %592 = vadd.xlane.f32.xlu0 %v591_v36  ;;  %834 = vmatpush.bf16.msra.mxu2 %v1513_v35 }
  0xf8   : > { %v597_v53 = vmul.f32 %v1902_v50, %v596_v52 }
  0xfa   : > { %v598_v54 = vadd.f32 %v1902_v50, %v597_v53  ;;  %v1748_v53 = vld [vmem:[#allocation7 + $0x4c] sm:$0xf] }
  0xfb   : > { %835 = vmatpush.bf16.msra.mxu2 %v1497_v47  ;;  %v1790_v47 = vld [vmem:[#allocation10 + $0x98] sm:$0xff] }
  0xfc   : > { %v2342_v55 = vsel %vm599_vm0, %v1902_v50, %v598_v54  ;;  %v1750_v50 = vld [vmem:[#allocation7 + $0x54] sm:$0xf0]  ;;  %v1506_v54 = vld [vmem:[#allocation7 + $0x58] sm:$0xf0] }
  0xfd   : > { %v1505_v52 = vor.u32 %v1750_v50, %v1504_v49  ;;  %v1775_v49 = vld [vmem:[#allocation10 + $0x20] sm:$0xff] }
  0xfe   : > { %v1783_v50 = vld [vmem:[#allocation10 + $0x60] sm:$0xff] }
  0xff   : > { %861 = vmatpush.bf16.msrb.mxu0 %v1505_v52  ;;  %v1797_v52 = vld [vmem:[#allocation10 + $0xd0] sm:$0xff] }
 0x103   : > { %862 = vmatpush.bf16.msrb.mxu0 %v1489_v2  ;;  %v1771_v2 = vld [vmem:[#allocation10] sm:$0xff] }
 0x107   : > { %863 = vmatpush.bf16.msrb.mxu0 %v1473_v15 }
 0x10b   : > { %1208 = vmatpush.bf16.msra.mxu0 %v1794_v19 }
 0x10f   : > { %1209 = vmatpush.bf16.msra.mxu0 %v1793_v22 }
 0x113   : > { %1210 = vmatpush.bf16.msra.mxu0 %v1792_v40 }
 0x117   : > { %1211 = vmatpush.bf16.msra.mxu0 %v1791_v43 }
 0x11b   : > { %1212 = vmatpush.bf16.msra.mxu0 %v1790_v47 }
 0x16a   : > { %v593_v56 = vpop.xlane.xlu0 %592 }
 0x16b   : > { %v601_v57 = vmul.f32 %v2342_v55, %v593_v56  ;;  %v1509_v56 = vor.u32 %v1748_v53, %v1506_v54  ;;  %v1774_v53 = vld [vmem:[#allocation10 + $0x18] sm:$0xff] }
 0x16c   : > { %v1782_v54 = vld [vmem:[#allocation10 + $0x58] sm:$0xff] }
 0x16d   : > { %v2345_v58 = vsub.f32 %v591_v36, %v601_v57  ;;  %v1514_v36 = vld [vmem:[#allocation7 + $0x70] sm:$0xf0]  ;;  %v1480_v57 = vld [vmem:[#allocation7 + $0x20] sm:$0xf]  ;;  %874 = vmatpush.bf16.msrb.mxu1 %v1509_v56  ;;  %v1788_v56 = vld [vmem:[#allocation10 + $0x88] sm:$0xff] }
 0x16e   : > { %v1517_v39 = vor.u32 %v1751_v34, %v1514_v36  ;;  %v2359_v34 = vld [vmem:[%s2413_s8] ss:$0 sm:$0xff] }
 0x16f   : > { %v603_v59 = vmul.f32 %v2345_v58, %v2345_v58 }
 0x170   : > { %847 = vmatpush.bf16.msra.mxu3 %v1517_v39  ;;  %v1786_v39 = vld [vmem:[#allocation10 + $0x78] sm:$0xff] }
 0x171   : > { %604 = vadd.xlane.f32.xlu0 %v603_v59  ;;  %v1745_v59 = vld [vmem:[#allocation7 + $0x2c] sm:$0xf0]  ;;  %875 = vmatpush.bf16.msrb.mxu1 %v1493_v6 }
 0x172   : > { %v1481_v61 = vor.u32 %v1745_v59, %v1480_v57  ;;  %v1796_v57 = vld [vmem:[#allocation10 + $0xc8] sm:$0xff]  ;;  %v1773_v59 = vld [vmem:[#allocation10 + $0x10] sm:$0xff] }
 0x174   : > { %848 = vmatpush.bf16.msra.mxu3 %v1501_v51  ;;  %836 = vmatpush.bf16.msra.mxu2 %v1481_v61  ;;  %v1789_v51 = vld [vmem:[#allocation10 + $0x90] sm:$0xff]  ;;  %v1787_v61 = vld [vmem:[#allocation10 + $0x80] sm:$0xff] }
 0x175   : > { %876 = vmatpush.bf16.msrb.mxu1 %v1477_v17  ;;  %1213 = vmatpush.bf16.msra.mxu0 %v1789_v51 }
 0x178   : > { %849 = vmatpush.bf16.msra.mxu3 %v1485_v1  ;;  %837 = vmatpush.bf16.msra.mxu2 %v1465_v10  ;;  %v660_v1 = vld [vmem:[#allocation8] sm:$0xf] }
 0x179   : > { %1221 = vmatpush.bf16.msra.mxu1 %v1802_v20  ;;  %1214 = vmatpush.bf16.msra.mxu0 %v1788_v56  ;;  %v664_v4 = vperm.slane %v660_v1, 2  ;;  %v665_v5 = vperm.slane %v660_v1, 3  ;;  %v662_v10 = vperm.slane %v660_v1, 0 }
 0x17c   : > { %850 = vmatpush.bf16.msra.mxu3 %v1469_v11  ;;  %1182 = vmatpush.bf16.msrb.mxu2 %v1778_v38  ;;  %v663_v11 = vperm.slane %v660_v1, 1 }
 0x17d   : > { %1222 = vmatpush.bf16.msra.mxu1 %v1801_v23  ;;  %1215 = vmatpush.bf16.msra.mxu0 %v1787_v61 }
 0x180   : > { %1195 = vmatpush.bf16.msrb.mxu3 %v1786_v39  ;;  %1183 = vmatpush.bf16.msrb.mxu2 %v1777_v41 }
 0x184   : > { %1196 = vmatpush.bf16.msrb.mxu3 %v1785_v42  ;;  %1184 = vmatpush.bf16.msrb.mxu2 %v1776_v45 }
 0x188   : > { %1197 = vmatpush.bf16.msrb.mxu3 %v1784_v46  ;;  %1185 = vmatpush.bf16.msrb.mxu2 %v1775_v49 }
 0x18c   : > { %1198 = vmatpush.bf16.msrb.mxu3 %v1783_v50  ;;  %1186 = vmatpush.bf16.msrb.mxu2 %v1774_v53 }
 0x190   : > { %1199 = vmatpush.bf16.msrb.mxu3 %v1782_v54  ;;  %1187 = vmatpush.bf16.msrb.mxu2 %v1773_v59 }
 0x194   : > { %1200 = vmatpush.bf16.msrb.mxu3 %v1781_v60  ;;  %1188 = vmatpush.bf16.msrb.mxu2 %v1772_v63 }
 0x198   : > { %1201 = vmatpush.bf16.msrb.mxu3 %v1780_v0  ;;  %1189 = vmatpush.bf16.msrb.mxu2 %v1771_v2  ;;  %v1898_v2 = vld [vmem:[%s2411_s6] ss:$0 sm:$0xff] }
 0x19c   : > { %1202 = vmatpush.bf16.msrb.mxu3 %v1779_v3 }
 0x1e4   : > { %v605_v18 = vpop.xlane.xlu0 %604 }
 0x1e5   : > { %v606_v21 = vmul.f32 %v605_v18, %v2342_v55 }
 0x1e7   : > { %v607_v24 = vadd.f32 1e-05, %v606_v21 }
 0x1e9   : > { %1903 = vrsqrt.f32 %v607_v24  ;;  %vm614_vm2 = vweird.f32 %v607_v24 }
 0x1ef   : > { %v1904_v25 = vpop.eup %1903 }
 0x1f0   : > { %v609_v26 = vmul.f32 %v1904_v25, %v607_v24  ;;  %vm615_vm1 = vweird.f32 %v1904_v25 }
 0x1f1   : > { %vm616_vm3 = vmor %vm614_vm2, %vm615_vm1 }
 0x1f2   : > { %v610_v27 = vmul.f32 %v1904_v25, %v609_v26 }
 0x1f4   : > { %v611_v28 = vmul.f32 0.5, %v610_v27 }
 0x1f6   : > { %v612_v29 = vsub.f32 1.5, %v611_v28 }
 0x1f8   : > { %v613_v30 = vmul.f32 %v1904_v25, %v612_v29 }
 0x1fa   : > { %v617_v32 = vsel %vm616_vm3, %v1904_v25, %v613_v30 }
 0x1fb   : > { %v618_v33 = vmul.f32 %v617_v32, %v2345_v58  ;;  %v1800_v58 = vld [vmem:[#allocation10 + $0xe8] sm:$0xff] }
 0x1fc   : > { %1223 = vmatpush.bf16.msra.mxu1 %v1800_v58 }
 0x1fd   : > { %v622_v35 = vmul.f32 %v2353_v31, %v618_v33 }
 0x1ff   : > { %v626_v36 = vadd.f32 %v2359_v34, %v622_v35 }
 0x200   : > { %1224 = vmatpush.bf16.msra.mxu1 %v1799_v44 }
 0x201   : > { %v627_v37 = vpack.c.bf16 %v626_v36, %v626_v36 }
 0x203   : > { %838 = vmatmul.bf16.vlgmr.msra.gmra.mxu2 %v627_v37  ;;  %851 = vmatmul.bf16.vlgmr.msra.gmra.mxu3 %v627_v37 }
 0x204   : > { %864 = vmatmul.bf16.vlgmr.msrb.gmra.mxu0 %v627_v37  ;;  %877 = vmatmul.bf16.vlgmr.msrb.gmra.mxu1 %v627_v37 }
 0x205   : > { %1225 = vmatpush.bf16.msra.mxu1 %v1798_v48 }
 0x209   : > { %1226 = vmatpush.bf16.msra.mxu1 %v1797_v52 }
 0x20d   : > { %1227 = vmatpush.bf16.msra.mxu1 %v1796_v57 }
 0x211   : > { %1228 = vmatpush.bf16.msra.mxu1 %v1795_v62 }
 0x281   : > { %v865_v6 = vpop.f32.mrf.mxu0  ;;  %v878_v7 = vpop.f32.mrf.mxu1 }
 0x282   : > { %v866_v8 = vadd.f32 %v865_v6, %v664_v4  ;;  %v879_v9 = vadd.f32 %v878_v7, %v665_v5 }
 0x284   : > { %v888_v12 = vmul.f32 0.044715, %v866_v8  ;;  %v889_v13 = vmul.f32 0.044715, %v879_v9  ;;  %v884_v43 = vmul.f32 0.5, %v866_v8  ;;  %v885_v45 = vmul.f32 0.5, %v879_v9 }
 0x286   : > { %v892_v14 = vmul.f32 %v888_v12, %v866_v8  ;;  %v893_v15 = vmul.f32 %v889_v13, %v879_v9  ;;  %v839_v16 = vpop.f32.mrf.mxu2  ;;  %v852_v17 = vpop.f32.mrf.mxu3 }
 0x287   : > { %v840_v18 = vadd.f32 %v839_v16, %v662_v10  ;;  %v853_v19 = vadd.f32 %v852_v17, %v663_v11 }
 0x288   : > { %v896_v20 = vmul.f32 %v892_v14, %v866_v8  ;;  %v897_v21 = vmul.f32 %v893_v15, %v879_v9 }
 0x289   : > { %v886_v22 = vmul.f32 0.044715, %v840_v18  ;;  %v887_v23 = vmul.f32 0.044715, %v853_v19  ;;  %v867_v24 = vpop.f32.mrf.mxu0  ;;  %v880_v25 = vpop.f32.mrf.mxu1  ;;  %v882_v53 = vmul.f32 0.5, %v840_v18  ;;  %v883_v56 = vmul.f32 0.5, %v853_v19 }
 0x28a   : > { %v900_v26 = vadd.f32 %v896_v20, %v866_v8  ;;  %v901_v27 = vadd.f32 %v897_v21, %v879_v9 }
 0x28b   : > { %v890_v28 = vmul.f32 %v886_v22, %v840_v18  ;;  %v891_v29 = vmul.f32 %v887_v23, %v853_v19 }
 0x28c   : > { %v904_v30 = vmul.f32 0.7978846, %v900_v26  ;;  %v905_v32 = vmul.f32 0.7978846, %v901_v27 }
 0x28d   : > { %v894_v33 = vmul.f32 %v890_v28, %v840_v18  ;;  %v895_v35 = vmul.f32 %v891_v29, %v853_v19 }
 0x28e   : > { %v841_v36 = vpop.f32.mrf.mxu2  ;;  %v854_v37 = vpop.f32.mrf.mxu3  ;;  %1905 = vtanh.f32 %v904_v30 }
 0x28f   : > { %1907 = vtanh.f32 %v905_v32  ;;  %v898_v38 = vadd.f32 %v894_v33, %v840_v18  ;;  %v899_v39 = vadd.f32 %v895_v35, %v853_v19 }
 0x291   : > { %v902_v40 = vmul.f32 0.7978846, %v898_v38  ;;  %v903_v58 = vmul.f32 0.7978846, %v899_v39 }
 0x293   : > { %1909 = vtanh.f32 %v902_v40 }
 0x294   : > { %v1906_v41 = vpop.eup %1905  ;;  %1911 = vtanh.f32 %v903_v58 }
 0x295   : > { %v1908_v42 = vpop.eup %1907  ;;  %v912_v44 = vadd.f32 1.0, %v1906_v41 }
 0x296   : > { %v913_v46 = vadd.f32 1.0, %v1908_v42 }
 0x297   : > { %v916_v47 = vmul.f32 %v912_v44, %v884_v43 }
 0x298   : > { %v917_v48 = vmul.f32 %v913_v46, %v885_v45 }
 0x299   : > { %v1910_v49 = vpop.eup %1909  ;;  %v920_v50 = vpack.c.bf16 %v916_v47, %v916_v47 }
 0x29a   : > { %v1912_v51 = vpop.eup %1911  ;;  %v921_v52 = vpack.c.bf16 %v917_v48, %v917_v48  ;;  %v910_v54 = vadd.f32 1.0, %v1910_v49 }
 0x29b   : > { %1216 = vmatmul.bf16.vlgmr.msra.gmra.mxu0 %v920_v50  ;;  %v911_v57 = vadd.f32 1.0, %v1912_v51 }
 0x29c   : > { %1229 = vmatmul.bf16.vlgmr.msra.gmra.mxu1 %v921_v52  ;;  %v914_v59 = vmul.f32 %v910_v54, %v882_v53 }
 0x29d   : > { %v915_v60 = vmul.f32 %v911_v57, %v883_v56 }
 0x29e   : > { %v918_v61 = vpack.c.bf16 %v914_v59, %v914_v59 }
 0x29f   : > { %v919_v62 = vpack.c.bf16 %v915_v60, %v915_v60 }
 0x2a0   : > { %1190 = vmatmul.bf16.vlgmr.msrb.gmra.mxu2 %v918_v61 }
 0x2a1   : > { %1203 = vmatmul.bf16.vlgmr.msrb.gmra.mxu3 %v919_v62 }
 0x318   : > { %v1217_v63 = vpop.f32.mrf.mxu0 }
 0x319   : > { %v1230_v0 = vpop.f32.mrf.mxu1 }
 0x320   : > { %v1219_v1 = vpop.f32.mrf.mxu0 }
 0x321   : > { %v1232_v3 = vpop.f32.mrf.mxu1 }
 0x323   : > { %v1191_v4 = vpop.f32.mrf.mxu2 }
 0x324   : > { %v1192_v5 = vadd.f32 %v1898_v2, %v1191_v4  ;;  %v1204_v6 = vpop.f32.mrf.mxu3 }
 0x326   : > { %v1205_v7 = vadd.f32 %v1204_v6, %v1192_v5 }
 0x328   : > { %v1218_v8 = vadd.f32 %v1217_v63, %v1205_v7 }
 0x32a   : > { %v1231_v9 = vadd.f32 %v1230_v0, %v1218_v8 }
 0x32b   : > { %v1193_v10 = vpop.f32.mrf.mxu2 }
 0x32c   : > { %v1206_v11 = vpop.f32.mrf.mxu3  ;;  %1234 = vadd.xlane.f32.xlu1 %v1231_v9 }
 0x39f   : > { %v1235_v12 = vpop.xlane.xlu1 %1234 }
 0x3a0   : > { %v1236_v13 = vmul.f32 %v1235_v12, %v2342_v55 }
 0x3a2   : > { %v1237_v14 = vsub.f32 %v1231_v9, %v1236_v13 }
 0x3a4   : > { %v1238_v15 = vmul.f32 %v1237_v14, %v1237_v14 }
 0x3a6   : > { %1239 = vadd.xlane.f32.xlu1 %v1238_v15 }
 0x419   : > { %v1240_v16 = vpop.xlane.xlu1 %1239 }
 0x41a   : > { %v1241_v17 = vmul.f32 %v1240_v16, %v2342_v55 }
 0x41c   : > { %v1242_v18 = vadd.f32 1e-05, %v1241_v17 }
 0x41e   : > { %1913 = vrsqrt.f32 %v1242_v18  ;;  %vm1249_vm5 = vweird.f32 %v1242_v18 }
 0x424   : > { %v1914_v19 = vpop.eup %1913 }
 0x425   : > { %v1244_v20 = vmul.f32 %v1914_v19, %v1242_v18  ;;  %vm1250_vm4 = vweird.f32 %v1914_v19 }
 0x426   : > { %vm1251_vm6 = vmor %vm1249_vm5, %vm1250_vm4 }
 0x427   : > { %v1245_v21 = vmul.f32 %v1914_v19, %v1244_v20 }
 0x429   : > { %v1246_v22 = vmul.f32 0.5, %v1245_v21 }
 0x42b   : > { %v1247_v23 = vsub.f32 1.5, %v1246_v22 }
 0x42d   : > { %v1248_v24 = vmul.f32 %v1914_v19, %v1247_v23 }
 0x42f   : > { %v1252_v55 = vsel %vm1251_vm6, %v1914_v19, %v1248_v24 }
 0x430   : > { %v1253_v25 = vmul.f32 %v1252_v55, %v1237_v14 }
 0x432   : > { %v1254_v26 = vmul.f32 %v2353_v31, %v1253_v25 }
 0x434   : > { %v1255_v27 = vadd.f32 %v2359_v34, %v1254_v26 }
 0x436   : > { %1256 = vst [vmem:[%s414_s14] sm:$0xff] %v1255_v27 }
 0x437   : > { %2092 = shalt.err (!%p2089_p9)
}
 0x438   : > { %1821 = dma.vmem_to_hbm [thread:$0]  (%p2287_p4), %s1271_s4, 128, %s1273_s1, %s1258_s16  }
 0x439 PF: > { %s1284_s29 = sand.u32 1, %s2127_s30   ;;  %p2430_p10 = scmp.ge.s32.totalorder %s2139_s12, 2 }
 0x43a   : > { %s1285_s24 = scalar_lea.sflag [#allocation4], %s1284_s29 }
 0x43b   : > { %p1841_p13 = pnand %p2430_p10, %p2291_p6 }
 0x43d   : > { %p1842_p11 = pneg %p1841_p13 }
 0x43f   : > { %2122 = dma.done.wait (%p1842_p11), %s1285_s24, 128  }
 0x440   : > { %2124 = vsyncadd (%p1842_p11), %s1285_s24, 4294967168  ;;  %p24_p0 = scmp.ge.s32.totalorder %s2261_s28, 4   ;;  %s2431_s30 = smov %s2131_s10 }
 0x441   : > { %s2432_s10 = smov %s2135_s11  ;;  %s2433_s11 = smov %s2272_s26 }
 0x442   : > { %s2434_s12 = smov %s2261_s28  ;;  %26 = sbr.rel (!%p24_p0) target bundleno = 12 (0xc), region = 117 }
 0x447   :  { %1291 = vsyncpa [#allocation3], 1 }
 0x448   :  { %1293 = vsyncpa [#allocation3 + $0x1], 1 }
 0x449   :  { %1294 = vsyncpa [#allocation6], 1 }
 0x44a   :  { %1295 = vsyncpa [#allocation9], 1 }
 0x44b   :  { %1296 = vsyncpa [#allocation4], 1 }
 0x44c   :  { %1298 = vsyncpa [#allocation4 + $0x1], 1 }

</bundles_post_ra>
